<compile_context>
chip_gen: v6e
topology: v6e:2x2x1
jax: 0.10.0
libtpu: 0.0.40
codegen_flags: <defaults>
</compile_context>

<pallas_src>
import jax
import jax.numpy as jnp
from jax.experimental import pallas as pl
from jax.experimental.pallas import tpu as pltpu


# ---------------------------------------------------------------------------
# Kernel
# ---------------------------------------------------------------------------
def _cdm_kernel(x_ref, w1_ref, b1_ref, w2_ref, b2_ref, w3_ref, b3_ref, o_ref):
    # x_ref: (1, C, T) -- one batch element, one lane-dense spatial tile.
    x = x_ref[0]                                                   # (C, T)

    # layer 1: 1x1 conv (BN folded) + ReLU.  bf16/f32 MXU, f32 accumulation.
    h1 = jnp.dot(w1_ref[...], x, preferred_element_type=jnp.float32)
    h1 = jnp.maximum(h1 + b1_ref[...], 0.0).astype(x.dtype)        # (C1, T)

    # layer 2: 1x1 conv (BN folded) + ReLU
    h2 = jnp.dot(w2_ref[...], h1, preferred_element_type=jnp.float32)
    h2 = jnp.maximum(h2 + b2_ref[...], 0.0).astype(x.dtype)        # (C2, T)

    # layer 3: 1x1 conv + Sigmoid
    # NOTE: the (C,1)->(C,T) bias lane-broadcasts are kept: folding the bias
    # into the matmul (ones-row concat) or pre-broadcasting to tile width
    # would cost more VMEM / HBM than three broadcasts in a DMA-bound kernel.
    h3 = jnp.dot(w3_ref[...], h2, preferred_element_type=jnp.float32)
    h3 = h3 + b3_ref[...]                                          # (1, T)
    o_ref[0] = jax.nn.sigmoid(h3).astype(o_ref.dtype)


# ---------------------------------------------------------------------------
# Tile selection (VMEM-budget driven)
# ---------------------------------------------------------------------------
def _pick_tile_hw(HW, N, C, C1, C2, C3, in_bytes, vmem_budget):
    """Largest lane-aligned spatial tile whose VMEM footprint fits the budget."""
    candidates = [t for t in
                  (65536, 32768, 16384, 8192, 4096, 2048, 1024, 512, 256, 128)
                  if t <= HW and HW % t == 0]
    if not candidates:
        return HW                       # block == full array dims (still correct)

    weight_bytes = ((C1 * C + C2 * C1 + C3 * C2) * in_bytes        # single-buffered
                    + (C1 + C2 + C3) * 4)                          # f32 bias columns

    def usage(t):
        io = 2 * C * t * in_bytes + 2 * C3 * t * 4     # double-buffered in / out tiles
        interm = (C1 + C2 + 2 * C3) * t * 6            # f32 + compute-dtype intermediates
        return weight_bytes + io + interm + (2 << 20)  # + fixed headroom

    fitting = [t for t in candidates if usage(t) <= vmem_budget]
    if not fitting:
        fitting = [candidates[-1]]
    if N == 1:
        # keep >= 2 grid steps so both v7x TensorCores get work
        multi = [t for t in fitting if HW // t >= 2]
        if multi:
            return multi[0]
    return fitting[0]


# ---------------------------------------------------------------------------
# Wrapper
# ---------------------------------------------------------------------------
def cloud_detection_pallas(x_nchw, folded_params, *,
                           compute_dtype=jnp.bfloat16, tile_hw=None):
    """x_nchw: (N, C, H, W) float32. Returns (N, 1, H, W) float32."""
    w1, b1, w2, b2, w3, b3 = folded_params
    N, C, H, W = x_nchw.shape
    HW = H * W
    C1, C2, C3 = w1.shape[0], w2.shape[0], w3.shape[0]

    in_bytes = jnp.dtype(compute_dtype).itemsize

    # Generation-aware VMEM budget (64 MiB/TC on v7x, 128 MiB on v5e/v6e).
    try:
        vmem_cap = int(pltpu.get_tpu_info().vmem_capacity_bytes)
    except Exception:
        vmem_cap = 64 * 1024 * 1024            # conservative fallback (v7x per-TC)
    vmem_budget = max(32 * 1024 * 1024, (vmem_cap * 3) // 4)

    if tile_hw is None:
        tile_hw = _pick_tile_hw(HW, N, C, C1, C2, C3, in_bytes, vmem_budget)
    assert HW % tile_hw == 0, "H*W must be divisible by the spatial tile"
    grid = (N, HW // tile_hw)

    # Stream activations and weights in compute_dtype (bf16 by default);
    # biases stay f32 and are added after the f32 MXU accumulation.
    x_flat = x_nchw.reshape(N, C, HW).astype(compute_dtype)
    W1, W2, W3 = (w.astype(compute_dtype) for w in (w1, w2, w3))

    def build(single_buffer_weights):
        if single_buffer_weights:
            def wspec(shape):
                return pl.BlockSpec(shape, lambda n, t: (0, 0),
                                    pipeline_mode=pl.Buffered(1))
        else:
            def wspec(shape):
                return pl.BlockSpec(shape, lambda n, t: (0, 0))
        return pl.pallas_call(
            _cdm_kernel,
            out_shape=jax.ShapeDtypeStruct((N, C3, HW), jnp.float32),
            grid_spec=pltpu.PrefetchScalarGridSpec(
                num_scalar_prefetch=0,
                grid=grid,
                in_specs=[
                    pl.BlockSpec((1, C, tile_hw), lambda n, t: (n, 0, t)),
                    wspec((C1, C)), wspec((C1, 1)),
                    wspec((C2, C1)), wspec((C2, 1)),
                    wspec((C3, C2)), wspec((C3, 1)),
                ],
                out_specs=pl.BlockSpec((1, C3, tile_hw), lambda n, t: (n, 0, t)),
            ),
            compiler_params=pltpu.CompilerParams(
                dimension_semantics=("parallel", "parallel"),
                vmem_limit_bytes=int(vmem_budget)),
        )

    args = (x_flat, W1, b1, W2, b2, W3, b3)
    try:
        out_flat = build(True)(*args)
    except Exception:
        # Fallback for environments without single-buffer pipeline_mode support.
        out_flat = build(False)(*args)

    return out_flat.reshape(N, C3, H, W)


# ---------------------------------------------------------------------------
# Parameter construction / BN folding / plain-JAX reference
# ---------------------------------------------------------------------------
def make_raw_params(key, dim):
    """Raw PyTorch-style parameters (conv weights as (Cout, Cin), biases, BN)."""
    C, C1, C2, C3 = dim, 2 * dim, 4 * dim, 1
    ks = jax.random.split(key, 14)

    def bn_params(k, c):
        kg, kb, km, kv = jax.random.split(k, 4)
        gamma = jax.random.uniform(kg, (c,), minval=0.5, maxval=1.5)
        beta = jax.random.normal(kb, (c,)) * 0.1
        mean = jax.random.normal(km, (c,)) * 0.1
        var = jax.random.uniform(kv, (c,), minval=0.5, maxval=1.5)
        return gamma, beta, mean, var

    w1 = jax.random.normal(ks[0], (C1, C)) * 0.2
    b1 = jax.random.normal(ks[1], (C1,)) * 0.1
    g1, be1, m1, v1 = bn_params(ks[2], C1)

    w2 = jax.random.normal(ks[3], (C2, C1)) * 0.2
    b2 = jax.random.normal(ks[4], (C2,)) * 0.1
    g2, be2, m2, v2 = bn_params(ks[5], C2)

    w3 = jax.random.normal(ks[6], (C3, C2)) * 0.2
    b3 = jax.random.normal(ks[7], (C3,)) * 0.1

    return (w1, b1, g1, be1, m1, v1, w2, b2, g2, be2, m2, v2, w3, b3)


def fold_params(raw, eps=1e-5):
    """Fold eval-mode BatchNorm into the 1x1 conv weights and biases."""
    (w1, b1, g1, be1, m1, v1, w2, b2, g2, be2, m2, v2, w3, b3) = raw
    s1 = g1 / jnp.sqrt(v1 + eps)
    W1 = w1 * s1[:, None]
    B1 = (b1 - m1) * s1 + be1
    s2 = g2 / jnp.sqrt(v2 + eps)
    W2 = w2 * s2[:, None]
    B2 = (b2 - m2) * s2 + be2
    return (W1, B1[:, None], W2, B2[:, None], w3, b3[:, None])


def cloud_detection_reference(x, raw, eps=1e-5):
    """Plain-JAX eval-mode reference matching the PyTorch module."""
    (w1, b1, g1, be1, m1, v1, w2, b2, g2, be2, m2, v2, w3, b3) = raw

    def conv1x1(x, w, b):  # x: (N, C, H, W), w: (Cout, Cin)
        return jnp.einsum('nchw,dc->ndhw', x, w) + b[None, :, None, None]

    def bn(y, g, be, m, v):
        inv = g / jnp.sqrt(v + eps)
        return (y - m[None, :, None, None]) * inv[None, :, None, None] \
            + be[None, :, None, None]

    y = jax.nn.relu(bn(conv1x1(x, w1, b1), g1, be1, m1, v1))
    y = jax.nn.relu(bn(conv1x1(y, w2, b2), g2, be2, m2, v2))
    return jax.nn.sigmoid(conv1x1(y, w3, b3))


# ---------------------------------------------------------------------------
# Self-test
# ---------------------------------------------------------------------------
if __name__ == "__main__":
    key = jax.random.PRNGKey(0)
    kx, kp = jax.random.split(key)

    N, dim, H, W = 2, 8, 16, 16
    x = jax.random.normal(kx, (N, dim, H, W), dtype=jnp.float32)

    raw = make_raw_params(kp, dim)
    folded = fold_params(raw)
    ref = jax.block_until_ready(cloud_detection_reference(x, raw))

    # f32 streaming path: tight tolerance against the plain-JAX reference.
    out_f32 = jax.block_until_ready(
        cloud_detection_pallas(x, folded, compute_dtype=jnp.float32))
    assert out_f32.shape == (N, 1, H, W), out_f32.shape
    assert jnp.allclose(out_f32, ref, rtol=1e-4, atol=1e-4), (
        f"f32 max abs diff {jnp.max(jnp.abs(out_f32 - ref))}")

    # default bf16 streaming path: looser tolerance (input/weight quantization).
    out_bf16 = jax.block_until_ready(cloud_detection_pallas(x, folded))
    assert out_bf16.shape == (N, 1, H, W), out_bf16.shape
    assert jnp.allclose(out_bf16, ref, rtol=3e-2, atol=3e-2), (
        f"bf16 max abs diff {jnp.max(jnp.abs(out_bf16 - ref))}")

    print("KERNEL_OK")
</pallas_src>

<mosaic_0001>
module attributes {stable_mosaic.version = 11 : i64} {
  func.func @_cdm_kernel(%arg0: i32, %arg1: i32, %arg2: memref<1x8x256xf32, #tpu.memory_space<vmem>>, %arg3: memref<16x8xf32, #tpu.memory_space<vmem>>, %arg4: memref<16x1xf32, #tpu.memory_space<vmem>>, %arg5: memref<32x16xf32, #tpu.memory_space<vmem>>, %arg6: memref<32x1xf32, #tpu.memory_space<vmem>>, %arg7: memref<1x32xf32, #tpu.memory_space<vmem>>, %arg8: memref<1x1xf32, #tpu.memory_space<vmem>>, %arg9: memref<1x1x256xf32, #tpu.memory_space<vmem>>) attributes {dimension_semantics = [#tpu.dimension_semantics<parallel>, #tpu.dimension_semantics<parallel>], iteration_bounds = array<i64: 2, 1>, scalar_prefetch = 0 : i64, scratch_operands = 0 : i64, tpu.core_type = #tpu.core_type<tc>, window_params = [{transform_indices = @transform_0, window_bounds = array<i64: 1, 8, 256>}, {pipeline_mode = #tpu.pipeline_mode<synchronous>, transform_indices = @transform_1, window_bounds = array<i64: 16, 8>}, {pipeline_mode = #tpu.pipeline_mode<synchronous>, transform_indices = @transform_2, window_bounds = array<i64: 16, 1>}, {pipeline_mode = #tpu.pipeline_mode<synchronous>, transform_indices = @transform_3, window_bounds = array<i64: 32, 16>}, {pipeline_mode = #tpu.pipeline_mode<synchronous>, transform_indices = @transform_4, window_bounds = array<i64: 32, 1>}, {pipeline_mode = #tpu.pipeline_mode<synchronous>, transform_indices = @transform_5, window_bounds = array<i64: 1, 32>}, {pipeline_mode = #tpu.pipeline_mode<synchronous>, transform_indices = @transform_6, window_bounds = array<i64: 1, 1>}, {transform_indices = @transform_7, window_bounds = array<i64: 1, 1, 256>}]} {
    %c0 = arith.constant 0 : index
    %c0_0 = arith.constant 0 : index
    %c0_1 = arith.constant 0 : index
    %0 = vector.load %arg2[%c0, %c0_0, %c0_1] : memref<1x8x256xf32, #tpu.memory_space<vmem>>, vector<1x8x256xf32>
    %1 = vector.shape_cast %0 : vector<1x8x256xf32> to vector<8x256xf32>
    %c0_2 = arith.constant 0 : index
    %c0_3 = arith.constant 0 : index
    %2 = vector.load %arg3[%c0_2, %c0_3] : memref<16x8xf32, #tpu.memory_space<vmem>>, vector<16x8xf32>
    %cst = arith.constant dense<0.000000e+00> : vector<16x256xf32>
    %3 = tpu.matmul %2, %1, %cst {dimension_numbers = #tpu.dot_dimension_numbers<[1], [0], [0], [1], [0, 0, 1, 1], [], []>} : vector<16x8xf32>, vector<8x256xf32>, vector<16x256xf32> -> vector<16x256xf32>
    %c0_4 = arith.constant 0 : index
    %c0_5 = arith.constant 0 : index
    %4 = vector.load %arg4[%c0_4, %c0_5] : memref<16x1xf32, #tpu.memory_space<vmem>>, vector<16x1xf32>
    %5 = vector.broadcast %4 : vector<16x1xf32> to vector<16x256xf32>
    %6 = arith.addf %3, %5 : vector<16x256xf32>
    %cst_6 = arith.constant 0.000000e+00 : f32
    %7 = vector.broadcast %cst_6 : f32 to vector<16x256xf32>
    %8 = arith.maximumf %6, %7 : vector<16x256xf32>
    %c0_7 = arith.constant 0 : index
    %c0_8 = arith.constant 0 : index
    %9 = vector.load %arg5[%c0_7, %c0_8] : memref<32x16xf32, #tpu.memory_space<vmem>>, vector<32x16xf32>
    %cst_9 = arith.constant dense<0.000000e+00> : vector<32x256xf32>
    %10 = tpu.matmul %9, %8, %cst_9 {dimension_numbers = #tpu.dot_dimension_numbers<[1], [0], [0], [1], [0, 0, 1, 1], [], []>} : vector<32x16xf32>, vector<16x256xf32>, vector<32x256xf32> -> vector<32x256xf32>
    %c0_10 = arith.constant 0 : index
    %c0_11 = arith.constant 0 : index
    %11 = vector.load %arg6[%c0_10, %c0_11] : memref<32x1xf32, #tpu.memory_space<vmem>>, vector<32x1xf32>
    %12 = vector.broadcast %11 : vector<32x1xf32> to vector<32x256xf32>
    %13 = arith.addf %10, %12 : vector<32x256xf32>
    %cst_12 = arith.constant 0.000000e+00 : f32
    %14 = vector.broadcast %cst_12 : f32 to vector<32x256xf32>
    %15 = arith.maximumf %13, %14 : vector<32x256xf32>
    %c0_13 = arith.constant 0 : index
    %c0_14 = arith.constant 0 : index
    %16 = vector.load %arg7[%c0_13, %c0_14] : memref<1x32xf32, #tpu.memory_space<vmem>>, vector<1x32xf32>
    %cst_15 = arith.constant dense<0.000000e+00> : vector<1x256xf32>
    %17 = tpu.matmul %16, %15, %cst_15 {dimension_numbers = #tpu.dot_dimension_numbers<[1], [0], [0], [1], [0, 0, 1, 1], [], []>} : vector<1x32xf32>, vector<32x256xf32>, vector<1x256xf32> -> vector<1x256xf32>
    %c0_16 = arith.constant 0 : index
    %c0_17 = arith.constant 0 : index
    %18 = vector.load %arg8[%c0_16, %c0_17] : memref<1x1xf32, #tpu.memory_space<vmem>>, vector<1x1xf32>
    %19 = vector.broadcast %18 : vector<1x1xf32> to vector<1x256xf32>
    %20 = arith.addf %17, %19 : vector<1x256xf32>
    %21 = arith.negf %20 : vector<1x256xf32>
    %22 = math.exp %21 : vector<1x256xf32>
    %cst_18 = arith.constant 1.000000e+00 : f32
    %23 = vector.broadcast %cst_18 : f32 to vector<1x256xf32>
    %24 = arith.addf %23, %22 : vector<1x256xf32>
    %25 = arith.divf %23, %24 : vector<1x256xf32>
    %c0_19 = arith.constant 0 : index
    %c0_20 = arith.constant 0 : index
    %c0_21 = arith.constant 0 : index
    %26 = vector.load %arg9[%c0_19, %c0_20, %c0_21] : memref<1x1x256xf32, #tpu.memory_space<vmem>>, vector<1x1x256xf32>
    %27 = vector.shape_cast %26 : vector<1x1x256xf32> to vector<1x256xf32>
    %28 = vector.shape_cast %25 : vector<1x256xf32> to vector<1x1x256xf32>
    tpu.vector_store %arg9[%c0_19, %c0_20, %c0_21], %28 {strides = array<i32>} : memref<1x1x256xf32, #tpu.memory_space<vmem>>, vector<1x1x256xf32>,
    return
  }
  func.func @transform_0(%arg0: i32, %arg1: i32) -> (i32, i32, i32) {
    %c0_i32 = arith.constant 0 : i32
    %c0_i32_0 = arith.constant 0 : i32
    return %arg0, %c0_i32, %arg1 : i32, i32, i32
  }
  func.func @transform_1(%arg0: i32, %arg1: i32) -> (i32, i32) {
    %c0_i32 = arith.constant 0 : i32
    %c0_i32_0 = arith.constant 0 : i32
    %c0_i32_1 = arith.constant 0 : i32
    return %c0_i32, %c0_i32_0 : i32, i32
  }
  func.func @transform_2(%arg0: i32, %arg1: i32) -> (i32, i32) {
    %c0_i32 = arith.constant 0 : i32
    %c0_i32_0 = arith.constant 0 : i32
    %c0_i32_1 = arith.constant 0 : i32
    return %c0_i32, %c0_i32_0 : i32, i32
  }
  func.func @transform_3(%arg0: i32, %arg1: i32) -> (i32, i32) {
    %c0_i32 = arith.constant 0 : i32
    %c0_i32_0 = arith.constant 0 : i32
    %c0_i32_1 = arith.constant 0 : i32
    return %c0_i32, %c0_i32_0 : i32, i32
  }
  func.func @transform_4(%arg0: i32, %arg1: i32) -> (i32, i32) {
    %c0_i32 = arith.constant 0 : i32
    %c0_i32_0 = arith.constant 0 : i32
    %c0_i32_1 = arith.constant 0 : i32
    return %c0_i32, %c0_i32_0 : i32, i32
  }
  func.func @transform_5(%arg0: i32, %arg1: i32) -> (i32, i32) {
    %c0_i32 = arith.constant 0 : i32
    %c0_i32_0 = arith.constant 0 : i32
    %c0_i32_1 = arith.constant 0 : i32
    return %c0_i32, %c0_i32_0 : i32, i32
  }
  func.func @transform_6(%arg0: i32, %arg1: i32) -> (i32, i32) {
    %c0_i32 = arith.constant 0 : i32
    %c0_i32_0 = arith.constant 0 : i32
    %c0_i32_1 = arith.constant 0 : i32
    return %c0_i32, %c0_i32_0 : i32, i32
  }
  func.func @transform_7(%arg0: i32, %arg1: i32) -> (i32, i32, i32) {
    %c0_i32 = arith.constant 0 : i32
    %c0_i32_0 = arith.constant 0 : i32
    return %arg0, %c0_i32, %arg1 : i32, i32, i32
  }
}

module attributes {stable_mosaic.version = 11 : i64} {
  func.func @_cdm_kernel(%arg0: i32, %arg1: i32, %arg2: memref<1x8x256xf32, #tpu.memory_space<vmem>>, %arg3: memref<16x8xf32, #tpu.memory_space<vmem>>, %arg4: memref<16x1xf32, #tpu.memory_space<vmem>>, %arg5: memref<32x16xf32, #tpu.memory_space<vmem>>, %arg6: memref<32x1xf32, #tpu.memory_space<vmem>>, %arg7: memref<1x32xf32, #tpu.memory_space<vmem>>, %arg8: memref<1x1xf32, #tpu.memory_space<vmem>>, %arg9: memref<1x1x256xf32, #tpu.memory_space<vmem>>) attributes {dimension_semantics = [#tpu.dimension_semantics<parallel>, #tpu.dimension_semantics<parallel>], iteration_bounds = array<i64: 2, 1>, scalar_prefetch = 0 : i64, scratch_operands = 0 : i64, tpu.core_type = #tpu.core_type<tc>, window_params = [{transform_indices = @transform_0, window_bounds = array<i64: 1, 8, 256>}, {pipeline_mode = #tpu.pipeline_mode<synchronous>, transform_indices = @transform_1, window_bounds = array<i64: 16, 8>}, {pipeline_mode = #tpu.pipeline_mode<synchronous>, transform_indices = @transform_2, window_bounds = array<i64: 16, 1>}, {pipeline_mode = #tpu.pipeline_mode<synchronous>, transform_indices = @transform_3, window_bounds = array<i64: 32, 16>}, {pipeline_mode = #tpu.pipeline_mode<synchronous>, transform_indices = @transform_4, window_bounds = array<i64: 32, 1>}, {pipeline_mode = #tpu.pipeline_mode<synchronous>, transform_indices = @transform_5, window_bounds = array<i64: 1, 32>}, {pipeline_mode = #tpu.pipeline_mode<synchronous>, transform_indices = @transform_6, window_bounds = array<i64: 1, 1>}, {transform_indices = @transform_7, window_bounds = array<i64: 1, 1, 256>}]} {
    %c0 = arith.constant 0 : index
    %c0_0 = arith.constant 0 : index
    %c0_1 = arith.constant 0 : index
    %0 = vector.load %arg2[%c0, %c0_0, %c0_1] : memref<1x8x256xf32, #tpu.memory_space<vmem>>, vector<1x8x256xf32>
    %1 = vector.shape_cast %0 : vector<1x8x256xf32> to vector<8x256xf32>
    %c0_2 = arith.constant 0 : index
    %c0_3 = arith.constant 0 : index
    %2 = vector.load %arg3[%c0_2, %c0_3] : memref<16x8xf32, #tpu.memory_space<vmem>>, vector<16x8xf32>
    %cst = arith.constant dense<0.000000e+00> : vector<16x256xf32>
    %3 = tpu.matmul %2, %1, %cst {dimension_numbers = #tpu.dot_dimension_numbers<[1], [0], [0], [1], [0, 0, 1, 1], [], []>} : vector<16x8xf32>, vector<8x256xf32>, vector<16x256xf32> -> vector<16x256xf32>
    %c0_4 = arith.constant 0 : index
    %c0_5 = arith.constant 0 : index
    %4 = vector.load %arg4[%c0_4, %c0_5] : memref<16x1xf32, #tpu.memory_space<vmem>>, vector<16x1xf32>
    %5 = vector.broadcast %4 : vector<16x1xf32> to vector<16x256xf32>
    %6 = arith.addf %3, %5 : vector<16x256xf32>
    %cst_6 = arith.constant 0.000000e+00 : f32
    %7 = vector.broadcast %cst_6 : f32 to vector<16x256xf32>
    %8 = arith.maximumf %6, %7 : vector<16x256xf32>
    %c0_7 = arith.constant 0 : index
    %c0_8 = arith.constant 0 : index
    %9 = vector.load %arg5[%c0_7, %c0_8] : memref<32x16xf32, #tpu.memory_space<vmem>>, vector<32x16xf32>
    %cst_9 = arith.constant dense<0.000000e+00> : vector<32x256xf32>
    %10 = tpu.matmul %9, %8, %cst_9 {dimension_numbers = #tpu.dot_dimension_numbers<[1], [0], [0], [1], [0, 0, 1, 1], [], []>} : vector<32x16xf32>, vector<16x256xf32>, vector<32x256xf32> -> vector<32x256xf32>
    %c0_10 = arith.constant 0 : index
    %c0_11 = arith.constant 0 : index
    %11 = vector.load %arg6[%c0_10, %c0_11] : memref<32x1xf32, #tpu.memory_space<vmem>>, vector<32x1xf32>
    %12 = vector.broadcast %11 : vector<32x1xf32> to vector<32x256xf32>
    %13 = arith.addf %10, %12 : vector<32x256xf32>
    %cst_12 = arith.constant 0.000000e+00 : f32
    %14 = vector.broadcast %cst_12 : f32 to vector<32x256xf32>
    %15 = arith.maximumf %13, %14 : vector<32x256xf32>
    %c0_13 = arith.constant 0 : index
    %c0_14 = arith.constant 0 : index
    %16 = vector.load %arg7[%c0_13, %c0_14] : memref<1x32xf32, #tpu.memory_space<vmem>>, vector<1x32xf32>
    %cst_15 = arith.constant dense<0.000000e+00> : vector<1x256xf32>
    %17 = tpu.matmul %16, %15, %cst_15 {dimension_numbers = #tpu.dot_dimension_numbers<[1], [0], [0], [1], [0, 0, 1, 1], [], []>} : vector<1x32xf32>, vector<32x256xf32>, vector<1x256xf32> -> vector<1x256xf32>
    %c0_16 = arith.constant 0 : index
    %c0_17 = arith.constant 0 : index
    %18 = vector.load %arg8[%c0_16, %c0_17] : memref<1x1xf32, #tpu.memory_space<vmem>>, vector<1x1xf32>
    %19 = vector.broadcast %18 : vector<1x1xf32> to vector<1x256xf32>
    %20 = arith.addf %17, %19 : vector<1x256xf32>
    %21 = arith.negf %20 : vector<1x256xf32>
    %22 = math.exp %21 : vector<1x256xf32>
    %cst_18 = arith.constant 1.000000e+00 : f32
    %23 = vector.broadcast %cst_18 : f32 to vector<1x256xf32>
    %24 = arith.addf %23, %22 : vector<1x256xf32>
    %25 = arith.divf %23, %24 : vector<1x256xf32>
    %c0_19 = arith.constant 0 : index
    %c0_20 = arith.constant 0 : index
    %c0_21 = arith.constant 0 : index
    %26 = vector.load %arg9[%c0_19, %c0_20, %c0_21] : memref<1x1x256xf32, #tpu.memory_space<vmem>>, vector<1x1x256xf32>
    %27 = vector.shape_cast %26 : vector<1x1x256xf32> to vector<1x256xf32>
    %28 = vector.shape_cast %25 : vector<1x256xf32> to vector<1x1x256xf32>
    tpu.vector_store %arg9[%c0_19, %c0_20, %c0_21], %28 {strides = array<i32>} : memref<1x1x256xf32, #tpu.memory_space<vmem>>, vector<1x1x256xf32>,
    return
  }
  func.func @transform_0(%arg0: i32, %arg1: i32) -> (i32, i32, i32) {
    %c0_i32 = arith.constant 0 : i32
    %c0_i32_0 = arith.constant 0 : i32
    return %arg0, %c0_i32, %arg1 : i32, i32, i32
  }
  func.func @transform_1(%arg0: i32, %arg1: i32) -> (i32, i32) {
    %c0_i32 = arith.constant 0 : i32
    %c0_i32_0 = arith.constant 0 : i32
    %c0_i32_1 = arith.constant 0 : i32
    return %c0_i32, %c0_i32_0 : i32, i32
  }
  func.func @transform_2(%arg0: i32, %arg1: i32) -> (i32, i32) {
    %c0_i32 = arith.constant 0 : i32
    %c0_i32_0 = arith.constant 0 : i32
    %c0_i32_1 = arith.constant 0 : i32
    return %c0_i32, %c0_i32_0 : i32, i32
  }
  func.func @transform_3(%arg0: i32, %arg1: i32) -> (i32, i32) {
    %c0_i32 = arith.constant 0 : i32
    %c0_i32_0 = arith.constant 0 : i32
    %c0_i32_1 = arith.constant 0 : i32
    return %c0_i32, %c0_i32_0 : i32, i32
  }
  func.func @transform_4(%arg0: i32, %arg1: i32) -> (i32, i32) {
    %c0_i32 = arith.constant 0 : i32
    %c0_i32_0 = arith.constant 0 : i32
    %c0_i32_1 = arith.constant 0 : i32
    return %c0_i32, %c0_i32_0 : i32, i32
  }
  func.func @transform_5(%arg0: i32, %arg1: i32) -> (i32, i32) {
    %c0_i32 = arith.constant 0 : i32
    %c0_i32_0 = arith.constant 0 : i32
    %c0_i32_1 = arith.constant 0 : i32
    return %c0_i32, %c0_i32_0 : i32, i32
  }
  func.func @transform_6(%arg0: i32, %arg1: i32) -> (i32, i32) {
    %c0_i32 = arith.constant 0 : i32
    %c0_i32_0 = arith.constant 0 : i32
    %c0_i32_1 = arith.constant 0 : i32
    return %c0_i32, %c0_i32_0 : i32, i32
  }
  func.func @transform_7(%arg0: i32, %arg1: i32) -> (i32, i32, i32) {
    %c0_i32 = arith.constant 0 : i32
    %c0_i32_0 = arith.constant 0 : i32
    return %arg0, %c0_i32, %arg1 : i32, i32, i32
  }
}

</mosaic_0001>

<bundles_post_ra>
// kernel: tpu_custom_call.1
= control target key start
LH: loop header
LB: loop body
LE: loop exit
PB: predicated region body
PF: predicated region fallthrough
CT: control target
= control target key end

     0   :  { %s1121_s0 = inlined_call_operand.vmem [shape: f32[2,8,256], index: 0, kind: input, shape index: {}]   ;;  %s1122_s1 = inlined_call_operand.vmem [shape: f32[16,8], index: 1, kind: input, shape index: {}]   ;;  %s1123_s2 = inlined_call_operand.vmem [shape: f32[16,1], index: 2, kind: input, shape index: {}]   ;;  %s1124_s3 = inlined_call_operand.vmem [shape: f32[32,16], index: 3, kind: input, shape index: {}]   ;;  %s1125_s4 = inlined_call_operand.vmem [shape: f32[32,1], index: 4, kind: input, shape index: {}]   ;;  %s1126_s5 = inlined_call_operand.vmem [shape: f32[1,32], index: 5, kind: input, shape index: {}]   ;;  %s1127_s6 = inlined_call_operand.<no memory space> [shape: f32[1,1], index: 6, kind: input, shape index: {}]   ;;  %s1128_s7 = inlined_call_operand.hbm [shape: f32[2,1,256], index: 7, kind: output, shape index: {}]  }
   0x1   :  { %v12_v0 = vstv %s1127_s6 }
   0x2   :  { %13 = vst [vmem:[#allocation2] sm:$0x1] %v12_v0 }
   0x3   :  { %14 = vsyncpa [#allocation4], 0 }
   0x4   :  { %16 = vsyncpa [#allocation4 + $0x1], 0  ;;  %s983_s26 = smov 0   ;;  %s985_s27 = smov 0  }
   0x5   :  { %s987_s28 = smov 0   ;;  %s989_s29 = smov 0  }
   0x6   :  { %s991_s30 = smov 0   ;;  %s993_s8 = smov 0  }
   0x7 LB: > { %s766_s6 = sadd.s32 4294967295, %s934_s8   ;;  %s767_s9 = sadd.s32 4294967294, %s934_s8   ;;  %s934_s8 = sphi %s993_s8, %s22_s8   ;;  %s930_s30 = sphi %s991_s30, %s1135_s30   ;;  %s926_s29 = sphi %s989_s29, %s1134_s29   ;;  %s922_s28 = sphi %s987_s28, %s1133_s28   ;;  %s918_s27 = sphi %s985_s27, %s1132_s27   ;;  %s914_s26 = sphi %s983_s26, %s1131_s26  }
   0x8   : > { %s34_s10 = sadd.s32 1, %s930_s30  ;;  %s197_s11 = sadd.s32 1, %s922_s28 }
   0x9   : > { %p36_p0 = scmp.ge.s32.totalorder %s34_s10, 2  ;;  %p207_p1 = scmp.ne.s32.totalorder %s922_s28, %s918_s27 }
   0xa   : > { %p208_p2 = scmp.eq.s32.totalorder %s766_s6, 1  ;;  %p213_p3 = scmp.ne.s32.totalorder %s918_s27, %s914_s26 }
   0xb   : > { %s1137_s10 = smov (%p36_p0, %s34_s10), 0  ;;  %p214_p5 = scmp.eq.s32.totalorder %s767_s9, 1 }
   0xc   : > { %p1023_p4 = por %p208_p2, %p207_p1  ;;  %s192_s13 = ssub.s32 %s930_s30, %s1137_s10 }
   0xd   : > { %p770_p6 = scmp.ge.s32.totalorder %s934_s8, 1  ;;  %p195_p7 = scmp.eq.s32.totalorder %s192_s13, 0 }
   0xe   : > { %p1030_p8 = por %p214_p5, %p213_p3  ;;  %p263_p9 = scmp.lt.s32.totalorder %s934_s8, 3 }
   0xf   : > { %s1036_s15 = scalar_select %p195_p7, %s922_s28, %s197_s11  }
  0x10   : > { %p264_p10 = pnand %p770_p6, %p263_p9 }
  0x11   : > { %p300_p11 = scmp.lt.s32.totalorder (!%p264_p10), %s926_s29, 1  ;;  %s296_s19 = sand.u32 (!%p264_p10), 1, %s918_s27  }
  0x12   : > { %267 = sbr.rel (%p264_p10) target bundleno = 704 (0x2c0), region = 48  ;;  %s771_s20 = sshll.u32 (!%p264_p10), %s296_s19, 1 }
  0x13   : > { %s298_s22 = scalar_lea.vmem (!%p264_p10), [#allocation3], %s771_s20  ;;  %s674_s9 = scalar_lea.sflag (!%p264_p10), [#allocation4], %s296_s19 }
  0x14   : > { %s690_s23 = sshll.u32 (!%p264_p10), %s298_s22, 4  ;;  %s939_s13 = smov (!%p264_p10), [#allocation3]   ;;  %s691_s23 = int_to_ptr.vmem [resolvable:$true] %s690_s23 }
  0x15   : > { %s858_s11 = scalar_lea.vmem (!%p264_p10), %s691_s23, 32  ;;  %s862_s16 = sshll.u32 (!%p264_p10), %s939_s13, 4  ;;  %s863_s16 = int_to_ptr.vmem [resolvable:$false] %s862_s16 }
  0x16   : > { %p859_p12 = scmp.ne.s32.totalorder (!%p264_p10), %s691_s23, %s858_s11  ;;  %p865_p1 = scmp.lt.s32.totalorder (!%p264_p10), %s691_s23, %s863_s16 }
  0x17   : > { %v936_v1 = vmov 0.0   ;;  %v937_v2 = vmov 0   ;;  %v315_v3 = vld [vmem:[%s1123_s2 + $0x8] sm:$0xff]  ;;  %s301_s18 = scalar_select %p300_p11, %s926_s29, 1  ;;  %v314_v4 = vld [vmem:[%s1123_s2] sm:$0xff]  ;;  %vm326_vm0 = vcmask 64512   ;;  %v559_v61 = vlaneseq }
  0x18   : > { %397 = vmatprep.mubr.f32.mxu0 %v936_v1  ;;  %848 = vset.pattern.permute.xlu0 %v937_v2  ;;  %v312_v7 = vld [vmem:[%s1122_s1] sm:$0xff]  ;;  %v419_v8 = vld [vmem:[%s1125_s4 + $0x8] sm:$0xff]  ;;  %v421_v11 = vld [vmem:[%s1125_s4 + $0x18] sm:$0xff]  ;;  %vm442_vm1 = vcmask 130048   ;;  %vm563_vm2 = vcmask 261120   ;;  %p860_p13 = pnand %p859_p12, %p1023_p4 }
  0x19   : > { %323 = vperm.xlu0 %848, %v315_v3   ;;  %519 = vmatprep.mubr.f32.mxu1 %v936_v1  ;;  %s788_s21 = sshll.u32 %s301_s18, 4  ;;  %v313_v9 = vld [vmem:[%s1122_s1 + $0x8] sm:$0xff]  ;;  %v553_v10 = vld [vmem:[#allocation2] sm:$0x1]  ;;  %v420_v12 = vld [vmem:[%s1125_s4 + $0x10] sm:$0xff]  ;;  %v560_v62 = vshrl.u32 %v559_v61, 7 }
  0x1a   : > { %849 = vset.pattern.permute.xlu1 %v937_v2  ;;  %s307_s24 = scalar_lea.vmem %s1121_s0, %s788_s21  ;;  %v418_v13 = vld [vmem:[%s1125_s4] sm:$0xff]  ;;  %v415_v29 = vld [vmem:[%s1124_s3 + $0x8] sm:$0xff]  ;;  %v416_v30 = vld [vmem:[%s1124_s3 + $0x10] sm:$0xff]  ;;  %s789_s21 = sshll.u32 %s926_s29, 5  ;;  %vm670_vm3 = vcmp.lt.s32.totalorder %v559_v61, 256 }
  0x1b   : > { %v311_v5 = vld [vmem:[%s307_s24 + $0x8] sm:$0xff]  ;;  %v310_v6 = vld [vmem:[%s307_s24] sm:$0xff]  ;;  %439 = vperm.xlu1 %849, %v421_v11   ;;  %v417_v31 = vld [vmem:[%s1124_s3 + $0x18] sm:$0xff]  ;;  %v561_v63 = vsub.s32 0, %v560_v62  ;;  %s688_s6 = scalar_lea.hbm %s1128_s7, %s789_s21  ;;  %p861_p0 = pneg %p860_p13 }
  0x1c   : > { %363 = vmatprep.subr.mxu0 %v311_v5  ;;  %v414_v28 = vld [vmem:[%s1124_s3] sm:$0xff]  ;;  %s864_s29 = scalar_lea.vmem %s863_s16, 64 }
  0x1d   : > { %318 = vperm.xlu0 %848, %v314_v4   ;;  %364 = vmatpush1.msra.mxu0 %v310_v6  ;;  %v552_v60 = vld [vmem:[%s1126_s5] sm:$0x1]  ;;  %p866_p2 = scmp.lt.s32.totalorder %s864_s29, %s858_s11 }
  0x1e   : > { %774 = vmatmul.mubr.msk.f32.vlgmr.msra.gmra.mxu0 %vm326_vm0, %v312_v7 }
  0x1f   : > { %403 = vmatprep.mubr.f32.mxu0 %v936_v1  ;;  %434 = vperm.xlu1 %849, %v420_v12   ;;  %v938_v12 = vmov 1966171168   ;;  %p867_p3 = por %p866_p2, %p865_p1 }
  0x21   : > { %429 = vperm.xlu0 %848, %v419_v8   ;;  %p868_p5 = pnand %p867_p3, %p861_p0 }
  0x22   : > { %775 = vmatmul.mubr.msk.f32.gmra.mxu0 %vm326_vm0, %v313_v9 }
  0x23   : > { %631 = vmatprep.mubr.f32.mxu0 %v936_v1  ;;  %424 = vperm.xlu1 %849, %v418_v13   ;;  %v654_v13 = vunpack.c.l.s4 %v938_v12 }
  0x25   : > { %556 = vperm.xlu0 %848, %v553_v10  }
  0x94   : > { %v324_v14 = vpop.permute.xlu0 %323 }
  0x96   : > { %v440_v35 = vpop.permute.xlu1 %439 }
  0x98   : > { %v319_v18 = vpop.permute.xlu0 %318 }
  0x9a   : > { %v435_v39 = vpop.permute.xlu1 %434 }
  0x9c   : > { %v430_v45 = vpop.permute.xlu0 %429 }
  0x9e   : > { %v425_v47 = vpop.permute.xlu1 %424 }
  0xa0   : > { %v557_v0 = vpop.permute.xlu0 %556 }
  0xde   : > { %v399_v15 = vpop.f32.mrf.mxu0 }
  0xdf   : > { %v400_v23 = vadd.f32 %v399_v15, %v319_v18 }
  0xe0   : > { %v401_v16 = vpop.f32.mrf.mxu0 }
  0xe1   : > { %v402_v21 = vadd.f32 %v401_v16, %v319_v18  ;;  %v410_v27 = vmax.f32 %v400_v23, 0.0 }
  0xe2   : > { %v405_v17 = vpop.f32.mrf.mxu0 }
  0xe3   : > { %v406_v19 = vadd.f32 %v405_v17, %v324_v14  ;;  %v411_v26 = vmax.f32 %v402_v21, 0.0 }
  0xe4   : > { %v407_v20 = vpop.f32.mrf.mxu0 }
  0xe5   : > { %v408_v22 = vadd.f32 %v407_v20, %v324_v14  ;;  %v412_v25 = vmax.f32 %v406_v19, 0.0  ;;  %v655_v14 = vunpack.c.0.s8 %v654_v13 }
  0xe7   : > { %v413_v24 = vmax.f32 %v408_v22, 0.0  ;;  %v658_v16 = vsub.s32 %v655_v14, %v560_v62 }
  0xe9   : > { %483 = vmatprep.subr.mxu1 %v413_v24 }
  0xea   : > { %484 = vmatpush1.msra.mxu1 %v412_v25 }
  0xeb   : > { %485 = vmatprep.subr.mxu1 %v411_v26 }
  0xec   : > { %486 = vmatpush1.msra.mxu1 %v410_v27 }
  0xed   : > { %776 = vmatmul.mubr.msk.f32.vlgmr.msra.gmra.mxu1 %vm442_vm1, %v414_v28 }
  0xee   : > { %525 = vmatprep.mubr.f32.mxu1 %v936_v1 }
  0xf1   : > { %777 = vmatmul.mubr.msk.f32.gmra.mxu1 %vm442_vm1, %v415_v29 }
  0xf2   : > { %531 = vmatprep.mubr.f32.mxu1 %v936_v1 }
  0xf5   : > { %778 = vmatmul.mubr.msk.f32.gmra.mxu1 %vm442_vm1, %v416_v30 }
  0xf6   : > { %537 = vmatprep.mubr.f32.mxu1 %v936_v1  ;;  %v562_v1 = vrot.slane %v557_v0, %v561_v63 }
  0xf9   : > { %779 = vmatmul.mubr.msk.f32.gmra.mxu1 %vm442_vm1, %v417_v31 }
 0x1ad   : > { %v521_v32 = vpop.f32.mrf.mxu1 }
 0x1ae   : > { %v522_v54 = vadd.f32 %v521_v32, %v425_v47 }
 0x1af   : > { %v523_v33 = vpop.f32.mrf.mxu1 }
 0x1b0   : > { %v524_v52 = vadd.f32 %v523_v33, %v425_v47  ;;  %v544_v59 = vmax.f32 %v522_v54, 0.0 }
 0x1b1   : > { %v527_v34 = vpop.f32.mrf.mxu1 }
 0x1b2   : > { %v528_v50 = vadd.f32 %v527_v34, %v430_v45  ;;  %v545_v58 = vmax.f32 %v524_v52, 0.0 }
 0x1b3   : > { %v529_v36 = vpop.f32.mrf.mxu1 }
 0x1b4   : > { %v530_v48 = vadd.f32 %v529_v36, %v430_v45  ;;  %v546_v57 = vmax.f32 %v528_v50, 0.0 }
 0x1b5   : > { %v533_v37 = vpop.f32.mrf.mxu1 }
 0x1b6   : > { %v534_v46 = vadd.f32 %v533_v37, %v435_v39  ;;  %v547_v56 = vmax.f32 %v530_v48, 0.0 }
 0x1b7   : > { %v535_v38 = vpop.f32.mrf.mxu1 }
 0x1b8   : > { %v536_v43 = vadd.f32 %v535_v38, %v435_v39  ;;  %v548_v55 = vmax.f32 %v534_v46, 0.0 }
 0x1b9   : > { %v539_v40 = vpop.f32.mrf.mxu1 }
 0x1ba   : > { %v540_v41 = vadd.f32 %v539_v40, %v440_v35  ;;  %v549_v53 = vmax.f32 %v536_v43, 0.0 }
 0x1bb   : > { %v541_v42 = vpop.f32.mrf.mxu1 }
 0x1bc   : > { %v542_v44 = vadd.f32 %v541_v42, %v440_v35  ;;  %v550_v51 = vmax.f32 %v540_v41, 0.0 }
 0x1be   : > { %v551_v49 = vmax.f32 %v542_v44, 0.0 }
 0x1c0   : > { %591 = vmatprep.subr.mxu0 %v551_v49 }
 0x1c1   : > { %592 = vmatpush1.msra.mxu0 %v550_v51 }
 0x1c2   : > { %593 = vmatprep.subr.mxu0 %v549_v53 }
 0x1c3   : > { %594 = vmatpush1.msra.mxu0 %v548_v55 }
 0x1c4   : > { %595 = vmatprep.subr.mxu0 %v547_v56 }
 0x1c5   : > { %596 = vmatpush1.msra.mxu0 %v546_v57 }
 0x1c6   : > { %597 = vmatprep.subr.mxu0 %v545_v58 }
 0x1c7   : > { %598 = vmatpush1.msra.mxu0 %v544_v59 }
 0x1c8   : > { %780 = vmatmul.mubr.msk.f32.vlgmr.msra.gmra.mxu0 %vm563_vm2, %v552_v60 }
 0x288   : > { %v633_v2 = vpop.f32.mrf.mxu0 }
 0x289   : > { %v634_v3 = vadd.f32 %v633_v2, %v562_v1 }
 0x28a   : > { %v635_v4 = vpop.f32.mrf.mxu0 }
 0x28b   : > { %v781_v5 = vmul.f32 -1.442695, %v634_v3  ;;  %v636_v6 = vadd.f32 %v635_v4, %v562_v1 }
 0x28d   : > { %850 = vpow2.f32 %v781_v5  ;;  %v782_v7 = vmul.f32 -1.442695, %v636_v6 }
 0x28f   : > { %852 = vpow2.f32 %v782_v7 }
 0x29a   : > { %v851_v8 = vpop.eup %850 }
 0x29b   : > { %v644_v9 = vadd.f32 1.0, %v851_v8 }
 0x29c   : > { %v853_v10 = vpop.eup %852 }
 0x29d   : > { %v645_v11 = vadd.f32 1.0, %v853_v10  ;;  %854 = vrcp.f32 %v644_v9 }
 0x29f   : > { %856 = vrcp.f32 %v645_v11 }
 0x2aa   : > { %v855_v15 = vpop.eup %854 }
 0x2ac   : > { %v857_v17 = vpop.eup %856 }
 0x2ad   : > { %v652_v18 = vcombine.low %v855_v15, %v857_v17 }
 0x2af   : > { %v659_v19 = vrot.slane %v652_v18, %v658_v16 }
 0x2b1   : > { %v666_v20 = vrot.slane %v659_v19, %v658_v16 }
 0x2b3   : > { %672 = vst.msk [vmem:[%s298_s22] sm:$0x3] %vm670_vm3, %v666_v20 }
 0x2b4   : > { %871 = shalt.err (!%p868_p5)
}
 0x2b5   : > { %s872_s17 = scalar_lea.hbm %s688_s6, 32  ;;  %s876_s20 = scalar_lea.hbm %s1128_s7, 64 }
 0x2b6   : > { %p873_p6 = scmp.ne.s32.totalorder %s688_s6, %s872_s17  ;;  %p877_p10 = scmp.lt.s32.totalorder %s688_s6, %s1128_s7 }
 0x2b7   : > { %p878_p11 = scmp.lt.s32.totalorder %s876_s20, %s872_s17 }
 0x2b8   : > { %p874_p7 = pnand %p873_p6, %p1023_p4 }
 0x2b9   : > { %p879_p12 = por %p878_p11, %p877_p10 }
 0x2ba   : > { %p875_p9 = pneg %p874_p7 }
 0x2bc   : > { %p880_p13 = pnand %p879_p12, %p875_p9 }
 0x2be   : > { %883 = shalt.err (!%p880_p13)
}
 0x2bf   : > { %790 = dma.vmem_to_hbm [thread:$0]  (%p1023_p4), %s691_s23, 32, %s688_s6, %s674_s9  }
 0x2c0 PF: > { %p796_p0 = scmp.ge.s32.totalorder %s934_s8, 2  ;;  %s702_s24 = sand.u32 1, %s914_s26  }
 0x2c1   : > { %s703_s25 = scalar_lea.sflag [#allocation4], %s702_s24 }
 0x2c2   : > { %p793_p1 = pnand %p796_p0, %p1030_p8 }
 0x2c4   : > { %p794_p2 = pneg %p793_p1 }
 0x2c6   : > { %909 = dma.done.wait (%p794_p2), %s703_s25, 32  }
 0x2c7   : > { %911 = vsyncadd (%p794_p2), %s703_s25, 4294967264  ;;  %s22_s8 = sadd.s32 1, %s934_s8   ;;  %s1131_s26 = smov %s918_s27 }
 0x2c8   : > { %p19_p3 = scmp.ge.s32.totalorder %s22_s8, 4   ;;  %s1132_s27 = smov %s922_s28 }
 0x2c9   : > { %s1133_s28 = smov %s1036_s15  ;;  %s1134_s29 = smov %s930_s30 }
 0x2ca   : > { %s1135_s30 = smov %s1137_s10  ;;  %21 = sbr.rel (!%p19_p3) target bundleno = 7 (0x7), region = 83 }
 0x2cf   :  { %708 = vsyncpa [#allocation4], 1 }
 0x2d0   :  { %710 = vsyncpa [#allocation4 + $0x1], 1 }

// kernel: tpu_custom_call.1
= control target key start
LH: loop header
LB: loop body
LE: loop exit
PB: predicated region body
PF: predicated region fallthrough
CT: control target
= control target key end

     0   :  { %s1121_s0 = inlined_call_operand.vmem [shape: f32[2,8,256], index: 0, kind: input, shape index: {}]   ;;  %s1122_s1 = inlined_call_operand.vmem [shape: f32[16,8], index: 1, kind: input, shape index: {}]   ;;  %s1123_s2 = inlined_call_operand.vmem [shape: f32[16,1], index: 2, kind: input, shape index: {}]   ;;  %s1124_s3 = inlined_call_operand.vmem [shape: f32[32,16], index: 3, kind: input, shape index: {}]   ;;  %s1125_s4 = inlined_call_operand.vmem [shape: f32[32,1], index: 4, kind: input, shape index: {}]   ;;  %s1126_s5 = inlined_call_operand.vmem [shape: f32[1,32], index: 5, kind: input, shape index: {}]   ;;  %s1127_s6 = inlined_call_operand.<no memory space> [shape: f32[1,1], index: 6, kind: input, shape index: {}]   ;;  %s1128_s7 = inlined_call_operand.hbm [shape: f32[2,1,256], index: 7, kind: output, shape index: {}]  }
   0x1   :  { %v12_v0 = vstv %s1127_s6 }
   0x2   :  { %13 = vst [vmem:[#allocation2] sm:$0x1] %v12_v0 }
   0x3   :  { %14 = vsyncpa [#allocation4], 0 }
   0x4   :  { %16 = vsyncpa [#allocation4 + $0x1], 0  ;;  %s983_s26 = smov 0   ;;  %s985_s27 = smov 0  }
   0x5   :  { %s987_s28 = smov 0   ;;  %s989_s29 = smov 0  }
   0x6   :  { %s991_s30 = smov 0   ;;  %s993_s8 = smov 0  }
   0x7 LB: > { %s766_s6 = sadd.s32 4294967295, %s934_s8   ;;  %s767_s9 = sadd.s32 4294967294, %s934_s8   ;;  %s934_s8 = sphi %s993_s8, %s22_s8   ;;  %s930_s30 = sphi %s991_s30, %s1135_s30   ;;  %s926_s29 = sphi %s989_s29, %s1134_s29   ;;  %s922_s28 = sphi %s987_s28, %s1133_s28   ;;  %s918_s27 = sphi %s985_s27, %s1132_s27   ;;  %s914_s26 = sphi %s983_s26, %s1131_s26  }
   0x8   : > { %s34_s10 = sadd.s32 1, %s930_s30  ;;  %s197_s11 = sadd.s32 1, %s922_s28 }
   0x9   : > { %p36_p0 = scmp.ge.s32.totalorder %s34_s10, 2  ;;  %p207_p1 = scmp.ne.s32.totalorder %s922_s28, %s918_s27 }
   0xa   : > { %p208_p2 = scmp.eq.s32.totalorder %s766_s6, 1  ;;  %p213_p3 = scmp.ne.s32.totalorder %s918_s27, %s914_s26 }
   0xb   : > { %s1137_s10 = smov (%p36_p0, %s34_s10), 0  ;;  %p214_p5 = scmp.eq.s32.totalorder %s767_s9, 1 }
   0xc   : > { %p1023_p4 = por %p208_p2, %p207_p1  ;;  %s192_s13 = ssub.s32 %s930_s30, %s1137_s10 }
   0xd   : > { %p770_p6 = scmp.ge.s32.totalorder %s934_s8, 1  ;;  %p195_p7 = scmp.eq.s32.totalorder %s192_s13, 0 }
   0xe   : > { %p1030_p8 = por %p214_p5, %p213_p3  ;;  %p263_p9 = scmp.lt.s32.totalorder %s934_s8, 3 }
   0xf   : > { %s1036_s15 = scalar_select %p195_p7, %s922_s28, %s197_s11  }
  0x10   : > { %p264_p10 = pnand %p770_p6, %p263_p9 }
  0x11   : > { %p300_p11 = scmp.lt.s32.totalorder (!%p264_p10), %s926_s29, 1  ;;  %s296_s19 = sand.u32 (!%p264_p10), 1, %s918_s27  }
  0x12   : > { %267 = sbr.rel (%p264_p10) target bundleno = 704 (0x2c0), region = 48  ;;  %s771_s20 = sshll.u32 (!%p264_p10), %s296_s19, 1 }
  0x13   : > { %s298_s22 = scalar_lea.vmem (!%p264_p10), [#allocation3], %s771_s20  ;;  %s674_s9 = scalar_lea.sflag (!%p264_p10), [#allocation4], %s296_s19 }
  0x14   : > { %s690_s23 = sshll.u32 (!%p264_p10), %s298_s22, 4  ;;  %s939_s13 = smov (!%p264_p10), [#allocation3]   ;;  %s691_s23 = int_to_ptr.vmem [resolvable:$true] %s690_s23 }
  0x15   : > { %s858_s11 = scalar_lea.vmem (!%p264_p10), %s691_s23, 32  ;;  %s862_s16 = sshll.u32 (!%p264_p10), %s939_s13, 4  ;;  %s863_s16 = int_to_ptr.vmem [resolvable:$false] %s862_s16 }
  0x16   : > { %p859_p12 = scmp.ne.s32.totalorder (!%p264_p10), %s691_s23, %s858_s11  ;;  %p865_p1 = scmp.lt.s32.totalorder (!%p264_p10), %s691_s23, %s863_s16 }
  0x17   : > { %v936_v1 = vmov 0.0   ;;  %v937_v2 = vmov 0   ;;  %v315_v3 = vld [vmem:[%s1123_s2 + $0x8] sm:$0xff]  ;;  %s301_s18 = scalar_select %p300_p11, %s926_s29, 1  ;;  %v314_v4 = vld [vmem:[%s1123_s2] sm:$0xff]  ;;  %vm326_vm0 = vcmask 64512   ;;  %v559_v61 = vlaneseq }
  0x18   : > { %397 = vmatprep.mubr.f32.mxu0 %v936_v1  ;;  %848 = vset.pattern.permute.xlu0 %v937_v2  ;;  %v312_v7 = vld [vmem:[%s1122_s1] sm:$0xff]  ;;  %v419_v8 = vld [vmem:[%s1125_s4 + $0x8] sm:$0xff]  ;;  %v421_v11 = vld [vmem:[%s1125_s4 + $0x18] sm:$0xff]  ;;  %vm442_vm1 = vcmask 130048   ;;  %vm563_vm2 = vcmask 261120   ;;  %p860_p13 = pnand %p859_p12, %p1023_p4 }
  0x19   : > { %323 = vperm.xlu0 %848, %v315_v3   ;;  %519 = vmatprep.mubr.f32.mxu1 %v936_v1  ;;  %s788_s21 = sshll.u32 %s301_s18, 4  ;;  %v313_v9 = vld [vmem:[%s1122_s1 + $0x8] sm:$0xff]  ;;  %v553_v10 = vld [vmem:[#allocation2] sm:$0x1]  ;;  %v420_v12 = vld [vmem:[%s1125_s4 + $0x10] sm:$0xff]  ;;  %v560_v62 = vshrl.u32 %v559_v61, 7 }
  0x1a   : > { %849 = vset.pattern.permute.xlu1 %v937_v2  ;;  %s307_s24 = scalar_lea.vmem %s1121_s0, %s788_s21  ;;  %v418_v13 = vld [vmem:[%s1125_s4] sm:$0xff]  ;;  %v415_v29 = vld [vmem:[%s1124_s3 + $0x8] sm:$0xff]  ;;  %v416_v30 = vld [vmem:[%s1124_s3 + $0x10] sm:$0xff]  ;;  %s789_s21 = sshll.u32 %s926_s29, 5  ;;  %vm670_vm3 = vcmp.lt.s32.totalorder %v559_v61, 256 }
  0x1b   : > { %v311_v5 = vld [vmem:[%s307_s24 + $0x8] sm:$0xff]  ;;  %v310_v6 = vld [vmem:[%s307_s24] sm:$0xff]  ;;  %439 = vperm.xlu1 %849, %v421_v11   ;;  %v417_v31 = vld [vmem:[%s1124_s3 + $0x18] sm:$0xff]  ;;  %v561_v63 = vsub.s32 0, %v560_v62  ;;  %s688_s6 = scalar_lea.hbm %s1128_s7, %s789_s21  ;;  %p861_p0 = pneg %p860_p13 }
  0x1c   : > { %363 = vmatprep.subr.mxu0 %v311_v5  ;;  %v414_v28 = vld [vmem:[%s1124_s3] sm:$0xff]  ;;  %s864_s29 = scalar_lea.vmem %s863_s16, 64 }
  0x1d   : > { %318 = vperm.xlu0 %848, %v314_v4   ;;  %364 = vmatpush1.msra.mxu0 %v310_v6  ;;  %v552_v60 = vld [vmem:[%s1126_s5] sm:$0x1]  ;;  %p866_p2 = scmp.lt.s32.totalorder %s864_s29, %s858_s11 }
  0x1e   : > { %774 = vmatmul.mubr.msk.f32.vlgmr.msra.gmra.mxu0 %vm326_vm0, %v312_v7 }
  0x1f   : > { %403 = vmatprep.mubr.f32.mxu0 %v936_v1  ;;  %434 = vperm.xlu1 %849, %v420_v12   ;;  %v938_v12 = vmov 1966171168   ;;  %p867_p3 = por %p866_p2, %p865_p1 }
  0x21   : > { %429 = vperm.xlu0 %848, %v419_v8   ;;  %p868_p5 = pnand %p867_p3, %p861_p0 }
  0x22   : > { %775 = vmatmul.mubr.msk.f32.gmra.mxu0 %vm326_vm0, %v313_v9 }
  0x23   : > { %631 = vmatprep.mubr.f32.mxu0 %v936_v1  ;;  %424 = vperm.xlu1 %849, %v418_v13   ;;  %v654_v13 = vunpack.c.l.s4 %v938_v12 }
  0x25   : > { %556 = vperm.xlu0 %848, %v553_v10  }
  0x94   : > { %v324_v14 = vpop.permute.xlu0 %323 }
  0x96   : > { %v440_v35 = vpop.permute.xlu1 %439 }
  0x98   : > { %v319_v18 = vpop.permute.xlu0 %318 }
  0x9a   : > { %v435_v39 = vpop.permute.xlu1 %434 }
  0x9c   : > { %v430_v45 = vpop.permute.xlu0 %429 }
  0x9e   : > { %v425_v47 = vpop.permute.xlu1 %424 }
  0xa0   : > { %v557_v0 = vpop.permute.xlu0 %556 }
  0xde   : > { %v399_v15 = vpop.f32.mrf.mxu0 }
  0xdf   : > { %v400_v23 = vadd.f32 %v399_v15, %v319_v18 }
  0xe0   : > { %v401_v16 = vpop.f32.mrf.mxu0 }
  0xe1   : > { %v402_v21 = vadd.f32 %v401_v16, %v319_v18  ;;  %v410_v27 = vmax.f32 %v400_v23, 0.0 }
  0xe2   : > { %v405_v17 = vpop.f32.mrf.mxu0 }
  0xe3   : > { %v406_v19 = vadd.f32 %v405_v17, %v324_v14  ;;  %v411_v26 = vmax.f32 %v402_v21, 0.0 }
  0xe4   : > { %v407_v20 = vpop.f32.mrf.mxu0 }
  0xe5   : > { %v408_v22 = vadd.f32 %v407_v20, %v324_v14  ;;  %v412_v25 = vmax.f32 %v406_v19, 0.0  ;;  %v655_v14 = vunpack.c.0.s8 %v654_v13 }
  0xe7   : > { %v413_v24 = vmax.f32 %v408_v22, 0.0  ;;  %v658_v16 = vsub.s32 %v655_v14, %v560_v62 }
  0xe9   : > { %483 = vmatprep.subr.mxu1 %v413_v24 }
  0xea   : > { %484 = vmatpush1.msra.mxu1 %v412_v25 }
  0xeb   : > { %485 = vmatprep.subr.mxu1 %v411_v26 }
  0xec   : > { %486 = vmatpush1.msra.mxu1 %v410_v27 }
  0xed   : > { %776 = vmatmul.mubr.msk.f32.vlgmr.msra.gmra.mxu1 %vm442_vm1, %v414_v28 }
  0xee   : > { %525 = vmatprep.mubr.f32.mxu1 %v936_v1 }
  0xf1   : > { %777 = vmatmul.mubr.msk.f32.gmra.mxu1 %vm442_vm1, %v415_v29 }
  0xf2   : > { %531 = vmatprep.mubr.f32.mxu1 %v936_v1 }
  0xf5   : > { %778 = vmatmul.mubr.msk.f32.gmra.mxu1 %vm442_vm1, %v416_v30 }
  0xf6   : > { %537 = vmatprep.mubr.f32.mxu1 %v936_v1  ;;  %v562_v1 = vrot.slane %v557_v0, %v561_v63 }
  0xf9   : > { %779 = vmatmul.mubr.msk.f32.gmra.mxu1 %vm442_vm1, %v417_v31 }
 0x1ad   : > { %v521_v32 = vpop.f32.mrf.mxu1 }
 0x1ae   : > { %v522_v54 = vadd.f32 %v521_v32, %v425_v47 }
 0x1af   : > { %v523_v33 = vpop.f32.mrf.mxu1 }
 0x1b0   : > { %v524_v52 = vadd.f32 %v523_v33, %v425_v47  ;;  %v544_v59 = vmax.f32 %v522_v54, 0.0 }
 0x1b1   : > { %v527_v34 = vpop.f32.mrf.mxu1 }
 0x1b2   : > { %v528_v50 = vadd.f32 %v527_v34, %v430_v45  ;;  %v545_v58 = vmax.f32 %v524_v52, 0.0 }
 0x1b3   : > { %v529_v36 = vpop.f32.mrf.mxu1 }
 0x1b4   : > { %v530_v48 = vadd.f32 %v529_v36, %v430_v45  ;;  %v546_v57 = vmax.f32 %v528_v50, 0.0 }
 0x1b5   : > { %v533_v37 = vpop.f32.mrf.mxu1 }
 0x1b6   : > { %v534_v46 = vadd.f32 %v533_v37, %v435_v39  ;;  %v547_v56 = vmax.f32 %v530_v48, 0.0 }
 0x1b7   : > { %v535_v38 = vpop.f32.mrf.mxu1 }
 0x1b8   : > { %v536_v43 = vadd.f32 %v535_v38, %v435_v39  ;;  %v548_v55 = vmax.f32 %v534_v46, 0.0 }
 0x1b9   : > { %v539_v40 = vpop.f32.mrf.mxu1 }
 0x1ba   : > { %v540_v41 = vadd.f32 %v539_v40, %v440_v35  ;;  %v549_v53 = vmax.f32 %v536_v43, 0.0 }
 0x1bb   : > { %v541_v42 = vpop.f32.mrf.mxu1 }
 0x1bc   : > { %v542_v44 = vadd.f32 %v541_v42, %v440_v35  ;;  %v550_v51 = vmax.f32 %v540_v41, 0.0 }
 0x1be   : > { %v551_v49 = vmax.f32 %v542_v44, 0.0 }
 0x1c0   : > { %591 = vmatprep.subr.mxu0 %v551_v49 }
 0x1c1   : > { %592 = vmatpush1.msra.mxu0 %v550_v51 }
 0x1c2   : > { %593 = vmatprep.subr.mxu0 %v549_v53 }
 0x1c3   : > { %594 = vmatpush1.msra.mxu0 %v548_v55 }
 0x1c4   : > { %595 = vmatprep.subr.mxu0 %v547_v56 }
 0x1c5   : > { %596 = vmatpush1.msra.mxu0 %v546_v57 }
 0x1c6   : > { %597 = vmatprep.subr.mxu0 %v545_v58 }
 0x1c7   : > { %598 = vmatpush1.msra.mxu0 %v544_v59 }
 0x1c8   : > { %780 = vmatmul.mubr.msk.f32.vlgmr.msra.gmra.mxu0 %vm563_vm2, %v552_v60 }
 0x288   : > { %v633_v2 = vpop.f32.mrf.mxu0 }
 0x289   : > { %v634_v3 = vadd.f32 %v633_v2, %v562_v1 }
 0x28a   : > { %v635_v4 = vpop.f32.mrf.mxu0 }
 0x28b   : > { %v781_v5 = vmul.f32 -1.442695, %v634_v3  ;;  %v636_v6 = vadd.f32 %v635_v4, %v562_v1 }
 0x28d   : > { %850 = vpow2.f32 %v781_v5  ;;  %v782_v7 = vmul.f32 -1.442695, %v636_v6 }
 0x28f   : > { %852 = vpow2.f32 %v782_v7 }
 0x29a   : > { %v851_v8 = vpop.eup %850 }
 0x29b   : > { %v644_v9 = vadd.f32 1.0, %v851_v8 }
 0x29c   : > { %v853_v10 = vpop.eup %852 }
 0x29d   : > { %v645_v11 = vadd.f32 1.0, %v853_v10  ;;  %854 = vrcp.f32 %v644_v9 }
 0x29f   : > { %856 = vrcp.f32 %v645_v11 }
 0x2aa   : > { %v855_v15 = vpop.eup %854 }
 0x2ac   : > { %v857_v17 = vpop.eup %856 }
 0x2ad   : > { %v652_v18 = vcombine.low %v855_v15, %v857_v17 }
 0x2af   : > { %v659_v19 = vrot.slane %v652_v18, %v658_v16 }
 0x2b1   : > { %v666_v20 = vrot.slane %v659_v19, %v658_v16 }
 0x2b3   : > { %672 = vst.msk [vmem:[%s298_s22] sm:$0x3] %vm670_vm3, %v666_v20 }
 0x2b4   : > { %871 = shalt.err (!%p868_p5)
}
 0x2b5   : > { %s872_s17 = scalar_lea.hbm %s688_s6, 32  ;;  %s876_s20 = scalar_lea.hbm %s1128_s7, 64 }
 0x2b6   : > { %p873_p6 = scmp.ne.s32.totalorder %s688_s6, %s872_s17  ;;  %p877_p10 = scmp.lt.s32.totalorder %s688_s6, %s1128_s7 }
 0x2b7   : > { %p878_p11 = scmp.lt.s32.totalorder %s876_s20, %s872_s17 }
 0x2b8   : > { %p874_p7 = pnand %p873_p6, %p1023_p4 }
 0x2b9   : > { %p879_p12 = por %p878_p11, %p877_p10 }
 0x2ba   : > { %p875_p9 = pneg %p874_p7 }
 0x2bc   : > { %p880_p13 = pnand %p879_p12, %p875_p9 }
 0x2be   : > { %883 = shalt.err (!%p880_p13)
}
 0x2bf   : > { %790 = dma.vmem_to_hbm [thread:$0]  (%p1023_p4), %s691_s23, 32, %s688_s6, %s674_s9  }
 0x2c0 PF: > { %p796_p0 = scmp.ge.s32.totalorder %s934_s8, 2  ;;  %s702_s24 = sand.u32 1, %s914_s26  }
 0x2c1   : > { %s703_s25 = scalar_lea.sflag [#allocation4], %s702_s24 }
 0x2c2   : > { %p793_p1 = pnand %p796_p0, %p1030_p8 }
 0x2c4   : > { %p794_p2 = pneg %p793_p1 }
 0x2c6   : > { %909 = dma.done.wait (%p794_p2), %s703_s25, 32  }
 0x2c7   : > { %911 = vsyncadd (%p794_p2), %s703_s25, 4294967264  ;;  %s22_s8 = sadd.s32 1, %s934_s8   ;;  %s1131_s26 = smov %s918_s27 }
 0x2c8   : > { %p19_p3 = scmp.ge.s32.totalorder %s22_s8, 4   ;;  %s1132_s27 = smov %s922_s28 }
 0x2c9   : > { %s1133_s28 = smov %s1036_s15  ;;  %s1134_s29 = smov %s930_s30 }
 0x2ca   : > { %s1135_s30 = smov %s1137_s10  ;;  %21 = sbr.rel (!%p19_p3) target bundleno = 7 (0x7), region = 83 }
 0x2cf   :  { %708 = vsyncpa [#allocation4], 1 }
 0x2d0   :  { %710 = vsyncpa [#allocation4 + $0x1], 1 }

</bundles_post_ra>
